<compile_context>
chip_gen: v6e
topology: v6e:2x2x1
jax: 0.10.0
libtpu: 0.0.40
codegen_flags: <defaults>
</compile_context>

<pallas_src>
import functools

import jax
import jax.numpy as jnp
from jax.experimental import pallas as pl
from jax.experimental.pallas import tpu as pltpu

_LANES = 128  # lane width of the packed weight slab (one full vreg row)


def _round_up(n, m):
    return ((n + m - 1) // m) * m


def _slab_layout(I, H, C):
    """Sublane(8)-aligned row offsets of each operand inside the packed slab."""
    off_wih = 0
    off_whh = off_wih + _round_up(I, 8)   # W_ih^T : (I, H)
    off_wfc = off_whh + _round_up(H, 8)   # W_hh^T : (H, H)
    off_brnn = off_wfc + _round_up(H, 8)  # W_fc^T : (H, C)
    off_bfc = off_brnn + 8                # b_ih + b_hh : (1, H)
    rows = off_bfc + 8                    # b_fc : (1, C)
    return off_wih, off_whh, off_wfc, off_brnn, off_bfc, rows


def _make_kernel(B, T, I, H, C):
    off_wih, off_whh, off_wfc, off_brnn, off_bfc, _ = _slab_layout(I, H, C)

    def kernel(x_ref, w_ref, out_ref):
        # x_ref  : (B*T, I) batch-first rows (row = b*T + t), f32
        # w_ref  : (rows, 128) packed {W_ih^T, W_hh^T, W_fc^T, b_ih+b_hh, b_fc}
        # out_ref: (B, C)
        wih = w_ref[off_wih:off_wih + I, 0:H]        # (I, H)
        whh = w_ref[off_whh:off_whh + H, 0:H]        # (H, H)
        wfc = w_ref[off_wfc:off_wfc + H, 0:C]        # (H, C)
        b_rnn = w_ref[off_brnn:off_brnn + 1, 0:H]    # (1, H) = b_ih + b_hh
        b_fc = w_ref[off_bfc:off_bfc + 1, 0:C]       # (1, C)

        # (1) Hoisted input projection for ALL time steps: one MXU matmul with
        #     the fused RNN bias; stays in vregs (no VMEM scratch round trip).
        xproj = (jnp.dot(x_ref[...], wih, preferred_element_type=jnp.float32)
                 + b_rnn)                            # (B*T, H)

        # Pre-split once into T time-step blocks: rows {b*T + t, b=0..B-1}.
        # Static slices + sublane concat, all off the serial critical path.
        xp = [
            jnp.concatenate(
                [xproj[b * T + t:b * T + t + 1, :] for b in range(B)], axis=0)
            for t in range(T)
        ]                                             # T x (B, H)

        # (2) Serial tanh recurrence. h0 == 0 -> step 0 skips the W_hh matmul.
        #     h lives in vregs through a statically unrolled loop (T is tiny).
        h = jnp.tanh(xp[0])
        for t in range(1, T):
            h = jnp.tanh(
                jnp.dot(h, whh, preferred_element_type=jnp.float32) + xp[t])

        # (3) Final Linear on the last hidden state.
        out_ref[...] = (
            jnp.dot(h, wfc, preferred_element_type=jnp.float32) + b_fc
        ).astype(out_ref.dtype)

    return kernel


def _pack_slab(w_ih, w_hh, b_ih, b_hh, w_fc, b_fc):
    """Pack all (pre-transposed) weights/biases into one (rows, 128) f32 slab.

    In a real model this is a one-time precomputation, not a per-call cost.
    """
    H, I = w_ih.shape
    C = w_fc.shape[0]
    off_wih, off_whh, off_wfc, off_brnn, off_bfc, rows = _slab_layout(I, H, C)

    def put(slab, a, row):
        a = jnp.pad(a.astype(jnp.float32), ((0, 0), (0, _LANES - a.shape[1])))
        return jax.lax.dynamic_update_slice(slab, a, (row, 0))

    slab = jnp.zeros((rows, _LANES), jnp.float32)
    slab = put(slab, jnp.transpose(w_ih), off_wih)            # (I, H)
    slab = put(slab, jnp.transpose(w_hh), off_whh)            # (H, H)
    slab = put(slab, jnp.transpose(w_fc), off_wfc)            # (H, C)
    slab = put(slab, (b_ih + b_hh).reshape(1, H), off_brnn)   # fused RNN bias
    slab = put(slab, b_fc.reshape(1, C), off_bfc)
    return slab


@jax.jit
def encoder_forward(x_btI, w_ih, w_hh, b_ih, b_hh, w_fc, b_fc):
    """x_btI: (B, T, I) batch-first piano-roll batch tensor (float32)."""
    B, T, I = x_btI.shape
    H = w_ih.shape[0]
    C = w_fc.shape[0]
    assert w_ih.shape == (H, I) and w_hh.shape == (H, H)
    assert b_ih.shape == (H,) and b_hh.shape == (H,)
    assert w_fc.shape == (C, H) and b_fc.shape == (C,)

    # Free view (no XLA transpose kernel): batch-first flatten, row = b*T + t.
    x_2d = x_btI.astype(jnp.float32).reshape(B * T, I)
    assert x_2d.shape[0] == B * T

    slab = _pack_slab(w_ih, w_hh, b_ih, b_hh, w_fc, b_fc)

    flops = 2 * T * B * I * H + 2 * (T - 1) * B * H * H + 2 * B * H * C
    cost = pl.CostEstimate(
        flops=flops,
        transcendentals=T * B * H,
        bytes_accessed=4 * (B * T * I + slab.size + B * C))

    return pl.pallas_call(
        _make_kernel(B, T, I, H, C),
        out_shape=jax.ShapeDtypeStruct((B, C), jnp.float32),
        in_specs=[pl.BlockSpec(memory_space=pltpu.MemorySpace.VMEM),
                  pl.BlockSpec(memory_space=pltpu.MemorySpace.VMEM)],
        out_specs=pl.BlockSpec(memory_space=pltpu.MemorySpace.VMEM),
        cost_estimate=cost,
    )(x_2d, slab)


def reference_forward(x_btI, w_ih, w_hh, b_ih, b_hh, w_fc, b_fc):
    """Pure-JAX reference of the PyTorch forward (tanh RNN + Linear on last h)."""
    B, T, I = x_btI.shape
    H = w_ih.shape[0]
    h = jnp.zeros((B, H), jnp.float32)
    for t in range(T):
        x_t = x_btI[:, t, :]
        h = jnp.tanh(x_t @ w_ih.T + b_ih + h @ w_hh.T + b_hh)
    return h @ w_fc.T + b_fc


if __name__ == "__main__":
    # Small, forward-consistent shapes:
    #   B=2 batch, T=8 sequence, I=16 pitch range (note_high - note_low + 1),
    #   H=32 rnn hidden, C=32 cmp hidden size.
    B, T, I, H, C = 2, 8, 16, 32, 32

    key = jax.random.PRNGKey(0)
    k_x, k_wih, k_whh, k_bih, k_bhh, k_wfc, k_bfc = jax.random.split(key, 7)

    x = jax.random.normal(k_x, (B, T, I), jnp.float32)
    w_ih = 0.1 * jax.random.normal(k_wih, (H, I), jnp.float32)
    w_hh = 0.1 * jax.random.normal(k_whh, (H, H), jnp.float32)
    b_ih = 0.1 * jax.random.normal(k_bih, (H,), jnp.float32)
    b_hh = 0.1 * jax.random.normal(k_bhh, (H,), jnp.float32)
    w_fc = 0.1 * jax.random.normal(k_wfc, (C, H), jnp.float32)
    b_fc = 0.1 * jax.random.normal(k_bfc, (C,), jnp.float32)

    out = encoder_forward(x, w_ih, w_hh, b_ih, b_hh, w_fc, b_fc)
    out = jax.block_until_ready(out)

    ref = reference_forward(x, w_ih, w_hh, b_ih, b_hh, w_fc, b_fc)
    assert out.shape == (B, C)
    assert jnp.allclose(out, ref, atol=1e-4, rtol=1e-4), (
        f"max err {jnp.max(jnp.abs(out - ref))}")

    print("KERNEL_OK")
</pallas_src>

<mosaic_0001>
module attributes {stable_mosaic.version = 11 : i64} {
  func.func @kernel(%arg0: memref<16x16xf32, #tpu.memory_space<vmem>>, %arg1: memref<96x128xf32, #tpu.memory_space<vmem>>, %arg2: memref<2x32xf32, #tpu.memory_space<vmem>>) attributes {dimension_semantics = [], scalar_prefetch = 0 : i64, scratch_operands = 0 : i64, tpu.core_type = #tpu.core_type<tc>} {
    %c0 = arith.constant 0 : index
    %c0_0 = arith.constant 0 : index
    %0 = vector.load %arg1[%c0, %c0_0] : memref<96x128xf32, #tpu.memory_space<vmem>>, vector<16x32xf32>
    %c16 = arith.constant 16 : index
    %c0_1 = arith.constant 0 : index
    %1 = vector.load %arg1[%c16, %c0_1] : memref<96x128xf32, #tpu.memory_space<vmem>>, vector<32x32xf32>
    %c48 = arith.constant 48 : index
    %c0_2 = arith.constant 0 : index
    %2 = vector.load %arg1[%c48, %c0_2] : memref<96x128xf32, #tpu.memory_space<vmem>>, vector<32x32xf32>
    %c80 = arith.constant 80 : index
    %c0_3 = arith.constant 0 : index
    %3 = vector.load %arg1[%c80, %c0_3] : memref<96x128xf32, #tpu.memory_space<vmem>>, vector<1x32xf32>
    %c88 = arith.constant 88 : index
    %c0_4 = arith.constant 0 : index
    %4 = vector.load %arg1[%c88, %c0_4] : memref<96x128xf32, #tpu.memory_space<vmem>>, vector<1x32xf32>
    %c0_5 = arith.constant 0 : index
    %c0_6 = arith.constant 0 : index
    %5 = vector.load %arg0[%c0_5, %c0_6] : memref<16x16xf32, #tpu.memory_space<vmem>>, vector<16x16xf32>
    %cst = arith.constant dense<0.000000e+00> : vector<16x32xf32>
    %6 = tpu.matmul %5, %0, %cst {dimension_numbers = #tpu.dot_dimension_numbers<[1], [0], [0], [1], [0, 0, 1, 1], [], []>} : vector<16x16xf32>, vector<16x32xf32>, vector<16x32xf32> -> vector<16x32xf32>
    %7 = vector.broadcast %3 : vector<1x32xf32> to vector<16x32xf32>
    %8 = arith.addf %6, %7 : vector<16x32xf32>
    %9 = vector.extract_strided_slice %8 {offsets = [0, 0], sizes = [1, 32], strides = [1, 1]} : vector<16x32xf32> to vector<1x32xf32>
    %10 = vector.extract_strided_slice %8 {offsets = [8, 0], sizes = [1, 32], strides = [1, 1]} : vector<16x32xf32> to vector<1x32xf32>
    %11 = tpu.concatenate %9, %10 in 0 : vector<1x32xf32>, vector<1x32xf32> -> vector<2x32xf32>
    %12 = vector.extract_strided_slice %8 {offsets = [1, 0], sizes = [1, 32], strides = [1, 1]} : vector<16x32xf32> to vector<1x32xf32>
    %13 = vector.extract_strided_slice %8 {offsets = [9, 0], sizes = [1, 32], strides = [1, 1]} : vector<16x32xf32> to vector<1x32xf32>
    %14 = tpu.concatenate %12, %13 in 0 : vector<1x32xf32>, vector<1x32xf32> -> vector<2x32xf32>
    %15 = vector.extract_strided_slice %8 {offsets = [2, 0], sizes = [1, 32], strides = [1, 1]} : vector<16x32xf32> to vector<1x32xf32>
    %16 = vector.extract_strided_slice %8 {offsets = [10, 0], sizes = [1, 32], strides = [1, 1]} : vector<16x32xf32> to vector<1x32xf32>
    %17 = tpu.concatenate %15, %16 in 0 : vector<1x32xf32>, vector<1x32xf32> -> vector<2x32xf32>
    %18 = vector.extract_strided_slice %8 {offsets = [3, 0], sizes = [1, 32], strides = [1, 1]} : vector<16x32xf32> to vector<1x32xf32>
    %19 = vector.extract_strided_slice %8 {offsets = [11, 0], sizes = [1, 32], strides = [1, 1]} : vector<16x32xf32> to vector<1x32xf32>
    %20 = tpu.concatenate %18, %19 in 0 : vector<1x32xf32>, vector<1x32xf32> -> vector<2x32xf32>
    %21 = vector.extract_strided_slice %8 {offsets = [4, 0], sizes = [1, 32], strides = [1, 1]} : vector<16x32xf32> to vector<1x32xf32>
    %22 = vector.extract_strided_slice %8 {offsets = [12, 0], sizes = [1, 32], strides = [1, 1]} : vector<16x32xf32> to vector<1x32xf32>
    %23 = tpu.concatenate %21, %22 in 0 : vector<1x32xf32>, vector<1x32xf32> -> vector<2x32xf32>
    %24 = vector.extract_strided_slice %8 {offsets = [5, 0], sizes = [1, 32], strides = [1, 1]} : vector<16x32xf32> to vector<1x32xf32>
    %25 = vector.extract_strided_slice %8 {offsets = [13, 0], sizes = [1, 32], strides = [1, 1]} : vector<16x32xf32> to vector<1x32xf32>
    %26 = tpu.concatenate %24, %25 in 0 : vector<1x32xf32>, vector<1x32xf32> -> vector<2x32xf32>
    %27 = vector.extract_strided_slice %8 {offsets = [6, 0], sizes = [1, 32], strides = [1, 1]} : vector<16x32xf32> to vector<1x32xf32>
    %28 = vector.extract_strided_slice %8 {offsets = [14, 0], sizes = [1, 32], strides = [1, 1]} : vector<16x32xf32> to vector<1x32xf32>
    %29 = tpu.concatenate %27, %28 in 0 : vector<1x32xf32>, vector<1x32xf32> -> vector<2x32xf32>
    %30 = vector.extract_strided_slice %8 {offsets = [7, 0], sizes = [1, 32], strides = [1, 1]} : vector<16x32xf32> to vector<1x32xf32>
    %31 = vector.extract_strided_slice %8 {offsets = [15, 0], sizes = [1, 32], strides = [1, 1]} : vector<16x32xf32> to vector<1x32xf32>
    %32 = tpu.concatenate %30, %31 in 0 : vector<1x32xf32>, vector<1x32xf32> -> vector<2x32xf32>
    %33 = math.tanh %11 : vector<2x32xf32>
    %cst_7 = arith.constant dense<0.000000e+00> : vector<2x32xf32>
    %34 = tpu.matmul %33, %1, %cst_7 {dimension_numbers = #tpu.dot_dimension_numbers<[1], [0], [0], [1], [0, 0, 1, 1], [], []>} : vector<2x32xf32>, vector<32x32xf32>, vector<2x32xf32> -> vector<2x32xf32>
    %35 = arith.addf %34, %14 : vector<2x32xf32>
    %36 = math.tanh %35 : vector<2x32xf32>
    %cst_8 = arith.constant dense<0.000000e+00> : vector<2x32xf32>
    %37 = tpu.matmul %36, %1, %cst_8 {dimension_numbers = #tpu.dot_dimension_numbers<[1], [0], [0], [1], [0, 0, 1, 1], [], []>} : vector<2x32xf32>, vector<32x32xf32>, vector<2x32xf32> -> vector<2x32xf32>
    %38 = arith.addf %37, %17 : vector<2x32xf32>
    %39 = math.tanh %38 : vector<2x32xf32>
    %cst_9 = arith.constant dense<0.000000e+00> : vector<2x32xf32>
    %40 = tpu.matmul %39, %1, %cst_9 {dimension_numbers = #tpu.dot_dimension_numbers<[1], [0], [0], [1], [0, 0, 1, 1], [], []>} : vector<2x32xf32>, vector<32x32xf32>, vector<2x32xf32> -> vector<2x32xf32>
    %41 = arith.addf %40, %20 : vector<2x32xf32>
    %42 = math.tanh %41 : vector<2x32xf32>
    %cst_10 = arith.constant dense<0.000000e+00> : vector<2x32xf32>
    %43 = tpu.matmul %42, %1, %cst_10 {dimension_numbers = #tpu.dot_dimension_numbers<[1], [0], [0], [1], [0, 0, 1, 1], [], []>} : vector<2x32xf32>, vector<32x32xf32>, vector<2x32xf32> -> vector<2x32xf32>
    %44 = arith.addf %43, %23 : vector<2x32xf32>
    %45 = math.tanh %44 : vector<2x32xf32>
    %cst_11 = arith.constant dense<0.000000e+00> : vector<2x32xf32>
    %46 = tpu.matmul %45, %1, %cst_11 {dimension_numbers = #tpu.dot_dimension_numbers<[1], [0], [0], [1], [0, 0, 1, 1], [], []>} : vector<2x32xf32>, vector<32x32xf32>, vector<2x32xf32> -> vector<2x32xf32>
    %47 = arith.addf %46, %26 : vector<2x32xf32>
    %48 = math.tanh %47 : vector<2x32xf32>
    %cst_12 = arith.constant dense<0.000000e+00> : vector<2x32xf32>
    %49 = tpu.matmul %48, %1, %cst_12 {dimension_numbers = #tpu.dot_dimension_numbers<[1], [0], [0], [1], [0, 0, 1, 1], [], []>} : vector<2x32xf32>, vector<32x32xf32>, vector<2x32xf32> -> vector<2x32xf32>
    %50 = arith.addf %49, %29 : vector<2x32xf32>
    %51 = math.tanh %50 : vector<2x32xf32>
    %cst_13 = arith.constant dense<0.000000e+00> : vector<2x32xf32>
    %52 = tpu.matmul %51, %1, %cst_13 {dimension_numbers = #tpu.dot_dimension_numbers<[1], [0], [0], [1], [0, 0, 1, 1], [], []>} : vector<2x32xf32>, vector<32x32xf32>, vector<2x32xf32> -> vector<2x32xf32>
    %53 = arith.addf %52, %32 : vector<2x32xf32>
    %54 = math.tanh %53 : vector<2x32xf32>
    %cst_14 = arith.constant dense<0.000000e+00> : vector<2x32xf32>
    %55 = tpu.matmul %54, %2, %cst_14 {dimension_numbers = #tpu.dot_dimension_numbers<[1], [0], [0], [1], [0, 0, 1, 1], [], []>} : vector<2x32xf32>, vector<32x32xf32>, vector<2x32xf32> -> vector<2x32xf32>
    %56 = vector.broadcast %4 : vector<1x32xf32> to vector<2x32xf32>
    %57 = arith.addf %55, %56 : vector<2x32xf32>
    %c0_15 = arith.constant 0 : index
    %c0_16 = arith.constant 0 : index
    %58 = vector.load %arg2[%c0_15, %c0_16] : memref<2x32xf32, #tpu.memory_space<vmem>>, vector<2x32xf32>
    tpu.vector_store %arg2[%c0_15, %c0_16], %57 {strides = array<i32>} : memref<2x32xf32, #tpu.memory_space<vmem>>, vector<2x32xf32>,
    return
  }
}

</mosaic_0001>

<bundles_post_ra>
// kernel: encoder_forward.1
= control target key start
LH: loop header
LB: loop body
LE: loop exit
PB: predicated region body
PF: predicated region fallthrough
CT: control target
= control target key end

     0   :  { %vm30_vm0 = vcmask 130048   ;;  %s1128_s0 = inlined_call_operand.vmem [shape: f32[16,16], index: 0, kind: input, shape index: {}]   ;;  %s1129_s1 = inlined_call_operand.vmem [shape: f32[96,128], index: 1, kind: input, shape index: {}]   ;;  %s1130_s2 = inlined_call_operand.hbm [shape: f32[2,32], index: 2, kind: output, shape index: {}]  }
   0x1   :  { %v13_v0 = vld [vmem:[%s1129_s1 + $0x8] sm:$0xff]  ;;  %v12_v1 = vld [vmem:[%s1129_s1] sm:$0xff] }
   0x2   :  { %v24_v2 = vld [vmem:[%s1128_s0] sm:$0xff]  ;;  %820 = vmatprep.subr.mxu0 %v13_v0 }
   0x3   :  { %824 = vmatprep.mubr.msk.f32.mxu0 %vm30_vm0, %v24_v2 }
   0x4   :  { %7 = vsyncpa [#allocation3], 0  ;;  %821 = vmatpush3.msra.mxu0 %v13_v0  ;;  %v25_v3 = vld [vmem:[%s1128_s0 + $0x8] sm:$0xff]  ;;  %v956_v5 = vmov 0.0   ;;  %v995_v6 = vld [vmem:[%s1129_s1 + $0x20] sm:$0xff]  ;;  %vm957_vm1 = vmmov 0  }
   0x5   :  { %822 = vmatprep.subr.mxu0 %v12_v1  ;;  %v989_v4 = vld [vmem:[%s1129_s1 + $0x28] sm:$0xff]  ;;  %827 = vmatprep.subr.mxu1 %v956_v5  ;;  %v1005_v7 = vld [vmem:[%s1129_s1 + $0x18] sm:$0xff]  ;;  %v1014_v8 = vld [vmem:[%s1129_s1 + $0x10] sm:$0xff]  ;;  %vm115_vm2 = vcmask 1040384   ;;  %vm152_vm3 = vcmask 261120   ;;  %s958_s8 = smov [#allocation2]  }
   0x6   :  { %823 = vmatpush3.msra.mxu0 %v12_v1  ;;  %835 = vmatprep.mubr.msk.f32.mxu1 %vm957_vm1, %v956_v5  ;;  %v764_v9 = vld [vmem:[%s1129_s1 + $0x50] ss:$0 sm:$0xff]  ;;  %v21_v61 = vld [vmem:[%s1129_s1 + $0x48] sm:$0xff]  ;;  %v20_v62 = vld [vmem:[%s1129_s1 + $0x40] sm:$0xff]  ;;  %s756_s9 = sshll.u32 %s958_s8, 4  ;;  %vm748_vm4 = vcmask 254976   ;;  %s757_s9 = int_to_ptr.vmem [resolvable:$true] %s756_s9 }
   0x7   :  { %825 = vmatmul.mubr.msk.f32.vlgmr.msra.gmra.mxu0 %vm30_vm0, %v25_v3  ;;  %828 = vmatpush3.msra.mxu1 %v989_v4  ;;  %v19_v63 = vld [vmem:[%s1129_s1 + $0x38] sm:$0xff]  ;;  %v18_v0 = vld [vmem:[%s1129_s1 + $0x30] sm:$0xff]  ;;  %s934_s10 = scalar_lea.vmem %s757_s9, 32  ;;  %p939_p1 = scmp.lt.s32.totalorder %s757_s9, %s757_s9 }
   0x8   :  { %838 = vmatprep.subr.mxu0 %v956_v5  ;;  %829 = vmatprep.subr.mxu1 %v956_v5  ;;  %p935_p0 = scmp.ne.s32.totalorder %s757_s9, %s934_s10  ;;  %p940_p2 = scmp.lt.s32.totalorder %s934_s10, %s934_s10 }
   0x9   :  { %839 = vmatpush3.msra.mxu0 %v989_v4  ;;  %830 = vmatpush3.msra.mxu1 %v995_v6 }
   0xa   :  { %840 = vmatprep.subr.mxu0 %v956_v5  ;;  %831 = vmatprep.subr.mxu1 %v956_v5  ;;  %p941_p3 = por %p940_p2, %p939_p1 }
   0xb   :  { %841 = vmatpush3.msra.mxu0 %v995_v6  ;;  %832 = vmatpush3.msra.mxu1 %v1005_v7 }
   0xc   :  { %842 = vmatprep.subr.mxu0 %v956_v5  ;;  %833 = vmatprep.subr.mxu1 %v956_v5  ;;  %p942_p4 = pnand %p941_p3, %p935_p0 }
   0xd   :  { %843 = vmatpush3.msra.mxu0 %v1005_v7  ;;  %834 = vmatpush3.msra.mxu1 %v1014_v8 }
   0xe   :  { %844 = vmatprep.subr.mxu0 %v956_v5  ;;  %846 = vmatprep.mubr.msk.f32.mxu0 %vm957_vm1, %v956_v5 }
   0xf   :  { %845 = vmatpush3.msra.mxu0 %v1014_v8  ;;  %849 = vmatprep.subr.mxu1 %v956_v5 }
  0x10   :  { %860 = vmatprep.subr.mxu0 %v956_v5 }
  0xc7   :  { %v826_v10 = vpop.f32.mrf.mxu0 }
  0xc8   :  { %v109_v11 = vadd.f32 %v826_v10, %v764_v9 }
  0xc9   :  { %v103_v12 = vpop.f32.mrf.mxu0 }
  0xca   :  { %v113_v13 = vrot.slane %v109_v11, 7  ;;  %v104_v14 = vadd.f32 %v764_v9, %v103_v12  ;;  %v123_v15 = vrot.slane %v109_v11, 1  ;;  %v128_v16 = vrot.slane %v109_v11, 2 }
  0xcb   :  { %v133_v17 = vrot.slane %v109_v11, 3  ;;  %v138_v18 = vrot.slane %v109_v11, 4  ;;  %v143_v19 = vrot.slane %v109_v11, 5  ;;  %v148_v20 = vrot.slane %v109_v11, 6 }
  0xcc   :  { %v116_v21 = vsel %vm115_vm2, %v104_v14, %v113_v13  ;;  %v118_v22 = vrot.slane %v104_v14, 1  ;;  %v121_v23 = vrot.slane %v104_v14, 2  ;;  %v126_v24 = vrot.slane %v104_v14, 3 }
  0xcd   :  { %918 = vtanh.f32 %v116_v21  ;;  %v131_v25 = vrot.slane %v104_v14, 4  ;;  %v136_v26 = vrot.slane %v104_v14, 5  ;;  %v141_v27 = vrot.slane %v104_v14, 6 }
  0xce   :  { %v120_v28 = vsel %vm115_vm2, %v118_v22, %v109_v11  ;;  %v125_v29 = vsel %vm115_vm2, %v121_v23, %v123_v15  ;;  %v130_v30 = vsel %vm115_vm2, %v126_v24, %v128_v16  ;;  %v146_v31 = vrot.slane %v104_v14, 7 }
  0xcf   :  { %v135_v32 = vsel %vm115_vm2, %v131_v25, %v133_v17  ;;  %v1037_v33 = vsel %vm115_vm2, %v136_v26, %v138_v18  ;;  %v1040_v34 = vsel %vm115_vm2, %v141_v27, %v143_v19 }
  0xd0   :  { %v1043_v35 = vsel %vm115_vm2, %v146_v31, %v148_v20 }
  0xda   :  { %v919_v36 = vpop.eup %918 }
  0xdb   :  { %836 = vmatmul.mubr.msk.f32.vlgmr.msra.gmra.mxu1 %vm152_vm3, %v919_v36 }
  0xdc   :  { %850 = vmatpush3.msra.mxu1 %v989_v4  ;;  %857 = vmatprep.mubr.msk.f32.mxu1 %vm957_vm1, %v956_v5 }
  0xdd   :  { %851 = vmatprep.subr.mxu1 %v956_v5 }
  0xde   :  { %852 = vmatpush3.msra.mxu1 %v995_v6 }
  0xdf   :  { %853 = vmatprep.subr.mxu1 %v956_v5 }
  0xe0   :  { %854 = vmatpush3.msra.mxu1 %v1005_v7 }
  0xe1   :  { %855 = vmatprep.subr.mxu1 %v956_v5 }
  0xe2   :  { %856 = vmatpush3.msra.mxu1 %v1014_v8 }
  0xe3   :  { %871 = vmatprep.subr.mxu1 %v956_v5 }
 0x19b   :  { %v222_v37 = vpop.f32.mrf.mxu1 }
 0x19c   :  { %v223_v38 = vadd.f32 %v222_v37, %v120_v28 }
 0x19d   :  { %v837_v39 = vpop.f32.mrf.mxu1 }
 0x19e   :  { %920 = vtanh.f32 %v223_v38 }
 0x1ab   :  { %v921_v40 = vpop.eup %920 }
 0x1ac   :  { %847 = vmatmul.mubr.msk.f32.vlgmr.msra.gmra.mxu0 %vm152_vm3, %v921_v40 }
 0x1ad   :  { %861 = vmatpush3.msra.mxu0 %v989_v4  ;;  %868 = vmatprep.mubr.msk.f32.mxu0 %vm957_vm1, %v956_v5 }
 0x1ae   :  { %862 = vmatprep.subr.mxu0 %v956_v5 }
 0x1af   :  { %863 = vmatpush3.msra.mxu0 %v995_v6 }
 0x1b0   :  { %864 = vmatprep.subr.mxu0 %v956_v5 }
 0x1b1   :  { %865 = vmatpush3.msra.mxu0 %v1005_v7 }
 0x1b2   :  { %866 = vmatprep.subr.mxu0 %v956_v5 }
 0x1b3   :  { %867 = vmatpush3.msra.mxu0 %v1014_v8 }
 0x1b4   :  { %882 = vmatprep.subr.mxu0 %v956_v5 }
 0x26c   :  { %v296_v41 = vpop.f32.mrf.mxu0 }
 0x26d   :  { %v297_v42 = vadd.f32 %v296_v41, %v125_v29 }
 0x26e   :  { %v848_v43 = vpop.f32.mrf.mxu0 }
 0x26f   :  { %922 = vtanh.f32 %v297_v42 }
 0x27c   :  { %v923_v44 = vpop.eup %922 }
 0x27d   :  { %858 = vmatmul.mubr.msk.f32.vlgmr.msra.gmra.mxu1 %vm152_vm3, %v923_v44 }
 0x27e   :  { %872 = vmatpush3.msra.mxu1 %v989_v4  ;;  %879 = vmatprep.mubr.msk.f32.mxu1 %vm957_vm1, %v956_v5 }
 0x27f   :  { %873 = vmatprep.subr.mxu1 %v956_v5 }
 0x280   :  { %874 = vmatpush3.msra.mxu1 %v995_v6 }
 0x281   :  { %875 = vmatprep.subr.mxu1 %v956_v5 }
 0x282   :  { %876 = vmatpush3.msra.mxu1 %v1005_v7 }
 0x283   :  { %877 = vmatprep.subr.mxu1 %v956_v5 }
 0x284   :  { %878 = vmatpush3.msra.mxu1 %v1014_v8 }
 0x285   :  { %893 = vmatprep.subr.mxu1 %v956_v5 }
 0x33d   :  { %v370_v45 = vpop.f32.mrf.mxu1 }
 0x33e   :  { %v371_v46 = vadd.f32 %v370_v45, %v130_v30 }
 0x33f   :  { %v859_v47 = vpop.f32.mrf.mxu1 }
 0x340   :  { %924 = vtanh.f32 %v371_v46 }
 0x34d   :  { %v925_v48 = vpop.eup %924 }
 0x34e   :  { %869 = vmatmul.mubr.msk.f32.vlgmr.msra.gmra.mxu0 %vm152_vm3, %v925_v48 }
 0x34f   :  { %883 = vmatpush3.msra.mxu0 %v989_v4  ;;  %890 = vmatprep.mubr.msk.f32.mxu0 %vm957_vm1, %v956_v5 }
 0x350   :  { %884 = vmatprep.subr.mxu0 %v956_v5 }
 0x351   :  { %885 = vmatpush3.msra.mxu0 %v995_v6 }
 0x352   :  { %886 = vmatprep.subr.mxu0 %v956_v5 }
 0x353   :  { %887 = vmatpush3.msra.mxu0 %v1005_v7 }
 0x354   :  { %888 = vmatprep.subr.mxu0 %v956_v5 }
 0x355   :  { %889 = vmatpush3.msra.mxu0 %v1014_v8 }
 0x356   :  { %904 = vmatprep.subr.mxu0 %v956_v5 }
 0x40e   :  { %v444_v49 = vpop.f32.mrf.mxu0 }
 0x40f   :  { %v445_v50 = vadd.f32 %v444_v49, %v135_v32 }
 0x410   :  { %v870_v51 = vpop.f32.mrf.mxu0 }
 0x411   :  { %926 = vtanh.f32 %v445_v50 }
 0x41e   :  { %v927_v52 = vpop.eup %926 }
 0x41f   :  { %880 = vmatmul.mubr.msk.f32.vlgmr.msra.gmra.mxu1 %vm152_vm3, %v927_v52 }
 0x420   :  { %894 = vmatpush3.msra.mxu1 %v989_v4  ;;  %901 = vmatprep.mubr.msk.f32.mxu1 %vm957_vm1, %v956_v5 }
 0x421   :  { %895 = vmatprep.subr.mxu1 %v956_v5 }
 0x422   :  { %896 = vmatpush3.msra.mxu1 %v995_v6  ;;  %v774_v6 = vld [vmem:[%s1129_s1 + $0x58] ss:$0 sm:$0xff] }
 0x423   :  { %897 = vmatprep.subr.mxu1 %v956_v5 }
 0x424   :  { %898 = vmatpush3.msra.mxu1 %v1005_v7 }
 0x425   :  { %899 = vmatprep.subr.mxu1 %v956_v5 }
 0x426   :  { %900 = vmatpush3.msra.mxu1 %v1014_v8 }
 0x4df   :  { %v518_v53 = vpop.f32.mrf.mxu1 }
 0x4e0   :  { %v519_v54 = vadd.f32 %v518_v53, %v1037_v33 }
 0x4e1   :  { %v881_v55 = vpop.f32.mrf.mxu1 }
 0x4e2   :  { %928 = vtanh.f32 %v519_v54 }
 0x4ef   :  { %v929_v56 = vpop.eup %928 }
 0x4f0   :  { %891 = vmatmul.mubr.msk.f32.vlgmr.msra.gmra.mxu0 %vm152_vm3, %v929_v56 }
 0x4f1   :  { %912 = vmatprep.mubr.msk.f32.mxu0 %vm957_vm1, %v956_v5  ;;  %905 = vmatpush3.msra.mxu0 %v21_v61 }
 0x4f2   :  { %906 = vmatprep.subr.mxu0 %v956_v5 }
 0x4f3   :  { %907 = vmatpush3.msra.mxu0 %v20_v62 }
 0x4f4   :  { %908 = vmatprep.subr.mxu0 %v956_v5 }
 0x4f5   :  { %909 = vmatpush3.msra.mxu0 %v19_v63 }
 0x4f6   :  { %910 = vmatprep.subr.mxu0 %v956_v5 }
 0x4f7   :  { %911 = vmatpush3.msra.mxu0 %v18_v0 }
 0x5b0   :  { %v592_v57 = vpop.f32.mrf.mxu0 }
 0x5b1   :  { %v593_v58 = vadd.f32 %v592_v57, %v1040_v34 }
 0x5b2   :  { %v892_v59 = vpop.f32.mrf.mxu0 }
 0x5b3   :  { %930 = vtanh.f32 %v593_v58 }
 0x5c0   :  { %v931_v60 = vpop.eup %930 }
 0x5c1   :  { %902 = vmatmul.mubr.msk.f32.vlgmr.msra.gmra.mxu1 %vm152_vm3, %v931_v60 }
 0x681   :  { %v666_v1 = vpop.f32.mrf.mxu1 }
 0x682   :  { %v667_v2 = vadd.f32 %v666_v1, %v1043_v35 }
 0x683   :  { %v903_v3 = vpop.f32.mrf.mxu1 }
 0x684   :  { %932 = vtanh.f32 %v667_v2 }
 0x691   :  { %v933_v4 = vpop.eup %932 }
 0x692   :  { %913 = vmatmul.mubr.msk.f32.vlgmr.msra.gmra.mxu0 %vm152_vm3, %v933_v4 }
 0x752   :  { %v744_v7 = vpop.f32.mrf.mxu0 }
 0x753   :  { %v745_v8 = vadd.f32 %v774_v6, %v744_v7 }
 0x754   :  { %v914_v5 = vpop.f32.mrf.mxu0 }
 0x755   :  { %749 = vst.msk [vmem:[#allocation2] sm:$0x3] %vm748_vm4, %v745_v8 }
 0x756   :  { %945 = shalt.err (!%p942_p4)
}
 0x757   :  { %759 = dma.vmem_to_hbm [thread:$0]  %s757_s9, 32, %s1130_s2, [#allocation3]  }
 0x758   :  { %954 = dma.done.wait [#allocation3], 32  }
 0x759   :  { %955 = vsyncadd [#allocation3], 4294967264 }
 0x75a   :  { %763 = vsyncpa [#allocation3], 1 }

</bundles_post_ra>
